<compile_context>
chip_gen: v6e
topology: v6e:2x2x1
jax: 0.10.0
libtpu: 0.0.40
codegen_flags: <defaults>
</compile_context>

<pallas_src>
import jax
import jax.numpy as jnp
from jax.experimental import pallas as pl
from jax.experimental.pallas import tpu as pltpu


# ----------------------------------------------------------------------------
# Kernel
# ----------------------------------------------------------------------------
def lora_kv_kernel(x_ref, w_ref, b_ref, o_ref):
    # x_ref: (1, TM, C)    one M-tile of one modality's tokens
    # w_ref: (1, C, 2C)    this modality's fused [W_k^T | (W_v + B_i A_i)^T]
    # b_ref: (1, 2C)       shared K/V bias (f32)
    # o_ref: (1, TM, 2C)
    x = x_ref[0]
    w = w_ref[0]
    if x.dtype != w.dtype:
        # In-kernel cast (VPU) is cheaper than a wrapper-side HBM round trip.
        x = x.astype(w.dtype)
    kv = jnp.dot(x, w, preferred_element_type=jnp.float32)      # (TM, 2C) f32 acc
    kv = kv + b_ref[...].astype(jnp.float32)                     # (1, 2C) broadcast
    o_ref[0] = kv.astype(o_ref.dtype)                            # single lane-dense store


# ----------------------------------------------------------------------------
# Parameter preparation (hoist out of the per-step hot path)
# ----------------------------------------------------------------------------
def prepare_lora_kv_params(w_kv, b_kv, a_w, b_w, *, compute_dtype=None):
    """Fold LoRA into the V half and pre-transpose once per weight update.

    w_kv: (2C, C), b_kv: (2C,)        shared fused kv nn.Linear parameters
    a_w:  (4, r, C), b_w: (4, C, r)   per-modality LoRA A / B weights (bias-free)
    Returns:
      w_fused: (4, C, 2C)   [W_k^T | (W_v + B_i A_i)^T] per modality (in-major)
      bias:    (1, 2C)      f32 bias
    """
    out_dim, c = w_kv.shape
    assert out_dim == 2 * c, "kv must be a fused (2*dim, dim) projection"
    rank = a_w.shape[1]
    assert a_w.shape == (4, rank, c) and b_w.shape == (4, c, rank)

    wk_t = w_kv[:c].T                                             # (C, C) in-major, shared K
    delta = jnp.einsum("icr,irk->ick", b_w, a_w)                  # B_i @ A_i -> (4, C, C) (out,in)
    wv_eff_t = jnp.transpose(w_kv[c:][None, :, :] + delta,
                             (0, 2, 1))                           # (4, C, C) in-major
    w_fused = jnp.concatenate(
        [jnp.broadcast_to(wk_t, (4, c, c)), wv_eff_t], axis=-1)   # (4, C, 2C)
    if compute_dtype is not None:
        # NOTE: folding LoRA in f32 and then casting the fused weight loses a
        # little precision vs a separate f32 rank-r path; acceptable for bf16.
        w_fused = w_fused.astype(compute_dtype)
    bias = b_kv.reshape(1, out_dim).astype(jnp.float32)
    return w_fused, bias


# ----------------------------------------------------------------------------
# Wrapper
# ----------------------------------------------------------------------------
def _maybe_single_buffered(shape, index_map):
    """Single-buffer a block whose index only changes on the modality axis."""
    try:
        return pl.BlockSpec(shape, index_map, pipeline_mode=pl.Buffered(1))
    except Exception:  # older API without pipeline_mode / Buffered
        return pl.BlockSpec(shape, index_map)


def multimodal_lora_kv_apply(x, w_fused, bias, *, tm=None, out_dtype=None):
    """Run the kernel with pre-prepared parameters (hot-path entry point).

    x:       (bs_m, n, C) with bs_m % 4 == 0
    w_fused: (4, C, 2C) from prepare_lora_kv_params
    bias:    (1, 2C)
    tm:      rows per grid step (None -> auto per TPU generation / VMEM budget)
    out_dtype: output dtype (None -> x.dtype)
    """
    bs_m, n, c = x.shape
    assert bs_m % 4 == 0, "batch must hold the 4 modality slices"
    out_dim = 2 * c
    assert w_fused.shape == (4, c, out_dim) and bias.shape == (1, out_dim)
    if out_dtype is None:
        out_dtype = x.dtype
    # NOTE: stores stay correct for any C (full-width block), but C % 128 == 0
    # keeps them fully lane-dense on the 128-lane vreg.

    m = (bs_m // 4) * n
    x4 = x.reshape(4, m, c)

    x_bytes = x.dtype.itemsize
    w_bytes = w_fused.dtype.itemsize
    o_bytes = jnp.dtype(out_dtype).itemsize

    # ---- per-generation VMEM budget ----
    vmem_cap = 128 * 1024 * 1024
    try:
        vmem_cap = int(pltpu.get_tpu_info().vmem_capacity_bytes)
    except Exception:
        pass
    budget = int(vmem_cap * 0.7)

    def block_bytes(t):
        return (2 * t * c * x_bytes          # double-buffered x tile
                + c * out_dim * w_bytes      # single-buffered fused weight panel
                + out_dim * 4                # single-buffered f32 bias
                + 2 * t * out_dim * o_bytes  # double-buffered output tile
                + t * out_dim * 4)           # f32 matmul intermediate

    if tm is None:
        tm = 8
        for cand in (2048, 1024, 512, 256, 128, 64, 32, 16, 8):
            if block_bytes(cand) <= budget:
                tm = cand
                break
    tm = max(1, min(tm, m))

    # Prefer a tile size dividing m exactly -> no padded HBM copy of x.
    if m % tm != 0:
        for d in range(tm, 0, -1):
            if m % d == 0 and (d % 8 == 0 or d == m):
                tm = d
                break

    m_tiles = pl.cdiv(m, tm)
    m_pad = m_tiles * tm
    if m_pad != m:
        x4 = jnp.pad(x4, ((0, 0), (0, m_pad - m), (0, 0)))

    vmem_limit = min(vmem_cap, max(16 << 20, int(block_bytes(tm) * 1.3) + (4 << 20)))

    cost = pl.CostEstimate(
        flops=2 * 4 * m * c * out_dim,
        transcendentals=0,
        bytes_accessed=(4 * m * c * x_bytes
                        + 4 * c * out_dim * w_bytes + out_dim * 4
                        + 4 * m_pad * out_dim * o_bytes),
    )

    def build(single_buffer_weights):
        if single_buffer_weights:
            w_spec = _maybe_single_buffered((1, c, out_dim), lambda i, j: (i, 0, 0))
            b_spec = _maybe_single_buffered((1, out_dim), lambda i, j: (0, 0))
        else:
            w_spec = pl.BlockSpec((1, c, out_dim), lambda i, j: (i, 0, 0))
            b_spec = pl.BlockSpec((1, out_dim), lambda i, j: (0, 0))
        return pl.pallas_call(
            lora_kv_kernel,
            out_shape=jax.ShapeDtypeStruct((4, m_pad, out_dim), out_dtype),
            grid_spec=pltpu.PrefetchScalarGridSpec(
                num_scalar_prefetch=0,
                # modality outer (weights re-fetched only 4x), M tiles inner.
                grid=(4, m_tiles),
                in_specs=[
                    pl.BlockSpec((1, tm, c), lambda i, j: (i, j, 0)),
                    w_spec,
                    b_spec,
                ],
                out_specs=pl.BlockSpec((1, tm, out_dim), lambda i, j: (i, j, 0)),
            ),
            compiler_params=pltpu.CompilerParams(
                dimension_semantics=("parallel", "parallel"),
                vmem_limit_bytes=vmem_limit,
            ),
            cost_estimate=cost,
        )

    try:
        out = build(True)(x4, w_fused, bias)
    except Exception:
        # Fallback: default double-buffered weight panels.
        out = build(False)(x4, w_fused, bias)

    if m_pad != m:
        out = out[:, :m, :]
    return out.reshape(bs_m, n, out_dim)


def multimodal_lora_kv(x, w_kv, b_kv, a_w, b_w, *, tm=None,
                       compute_dtype=None, out_dtype=None):
    """Convenience wrapper: prepare params + run. In a step loop, call
    prepare_lora_kv_params once and multimodal_lora_kv_apply per step."""
    w_fused, bias = prepare_lora_kv_params(w_kv, b_kv, a_w, b_w,
                                           compute_dtype=compute_dtype)
    return multimodal_lora_kv_apply(x, w_fused, bias, tm=tm, out_dtype=out_dtype)


# ----------------------------------------------------------------------------
# Pure-JAX reference (mirrors the PyTorch forward)
# ----------------------------------------------------------------------------
def reference(x, w_kv, b_kv, a_w, b_w):
    bs_m, n, c = x.shape
    x4 = x.reshape(4, -1, n, c)
    outs = []
    for i in range(4):
        kv = x4[i] @ w_kv.T + b_kv
        new_v = (x4[i] @ a_w[i].T) @ b_w[i].T
        kv = kv.at[:, :, -c:].add(new_v)
        outs.append(kv)
    return jnp.stack(outs).reshape(bs_m, n, -1)


if __name__ == "__main__":
    dim = 32           # kv.in_features
    out_dim = 2 * dim  # fused K+V projection
    rank = 4           # LoRA rank
    n = 8              # sequence length
    bs_m = 8           # total batch (4 modalities x 2)

    key = jax.random.PRNGKey(0)
    kx, kw, kb, ka, kbb = jax.random.split(key, 5)

    x = jax.random.normal(kx, (bs_m, n, dim), dtype=jnp.float32)
    w_kv = jax.random.normal(kw, (out_dim, dim), dtype=jnp.float32) * 0.05
    b_kv = jax.random.normal(kb, (out_dim,), dtype=jnp.float32) * 0.05
    a_w = jax.random.normal(ka, (4, rank, dim), dtype=jnp.float32) * 0.05
    b_w = jax.random.normal(kbb, (4, dim, rank), dtype=jnp.float32) * 0.05

    ref = reference(x, w_kv, b_kv, a_w, b_w)

    # f32 path, auto tile size.
    out = jax.block_until_ready(multimodal_lora_kv(x, w_kv, b_kv, a_w, b_w))
    assert out.shape == (bs_m, n, out_dim)
    assert jnp.allclose(out, ref, atol=1e-4, rtol=1e-4), "f32 mismatch vs reference"

    # Small tile to exercise the (4, M_tiles) streaming grid.
    out_tiled = jax.block_until_ready(multimodal_lora_kv(x, w_kv, b_kv, a_w, b_w, tm=8))
    assert jnp.allclose(out_tiled, ref, atol=1e-4, rtol=1e-4), "tiled mismatch vs reference"

    # bf16 weights + in-kernel bf16 cast of x (f32 accumulation), f32 output.
    out_bf16 = jax.block_until_ready(
        multimodal_lora_kv(x, w_kv, b_kv, a_w, b_w,
                           compute_dtype=jnp.bfloat16, out_dtype=jnp.float32))
    assert jnp.allclose(out_bf16, ref, atol=5e-2, rtol=5e-2), "bf16 mismatch vs reference"

    # Hoisted weight-prep path (what a training/inference step loop should use).
    w_fused, bias = prepare_lora_kv_params(w_kv, b_kv, a_w, b_w)
    out_prep = jax.block_until_ready(multimodal_lora_kv_apply(x, w_fused, bias))
    assert jnp.allclose(out_prep, ref, atol=1e-4, rtol=1e-4), "prepared-params mismatch"

    print("KERNEL_OK")
</pallas_src>

<mosaic_0001>
module attributes {stable_mosaic.version = 11 : i64} {
  func.func @lora_kv_kernel(%arg0: i32, %arg1: i32, %arg2: memref<1x16x32xf32, #tpu.memory_space<vmem>>, %arg3: memref<1x32x64xf32, #tpu.memory_space<vmem>>, %arg4: memref<1x64xf32, #tpu.memory_space<vmem>>, %arg5: memref<1x16x64xf32, #tpu.memory_space<vmem>>) attributes {dimension_semantics = [#tpu.dimension_semantics<parallel>, #tpu.dimension_semantics<parallel>], iteration_bounds = array<i64: 4, 1>, scalar_prefetch = 0 : i64, scratch_operands = 0 : i64, tpu.core_type = #tpu.core_type<tc>, window_params = [{transform_indices = @transform_0, window_bounds = array<i64: 1, 16, 32>}, {pipeline_mode = #tpu.pipeline_mode<synchronous>, transform_indices = @transform_1, window_bounds = array<i64: 1, 32, 64>}, {pipeline_mode = #tpu.pipeline_mode<synchronous>, transform_indices = @transform_2, window_bounds = array<i64: 1, 64>}, {transform_indices = @transform_3, window_bounds = array<i64: 1, 16, 64>}]} {
    %c0 = arith.constant 0 : index
    %c0_0 = arith.constant 0 : index
    %c0_1 = arith.constant 0 : index
    %0 = vector.load %arg2[%c0, %c0_0, %c0_1] : memref<1x16x32xf32, #tpu.memory_space<vmem>>, vector<1x16x32xf32>
    %1 = vector.shape_cast %0 : vector<1x16x32xf32> to vector<16x32xf32>
    %c0_2 = arith.constant 0 : index
    %c0_3 = arith.constant 0 : index
    %c0_4 = arith.constant 0 : index
    %2 = vector.load %arg3[%c0_2, %c0_3, %c0_4] : memref<1x32x64xf32, #tpu.memory_space<vmem>>, vector<1x32x64xf32>
    %3 = vector.shape_cast %2 : vector<1x32x64xf32> to vector<32x64xf32>
    %cst = arith.constant dense<0.000000e+00> : vector<16x64xf32>
    %4 = tpu.matmul %1, %3, %cst {dimension_numbers = #tpu.dot_dimension_numbers<[1], [0], [0], [1], [0, 0, 1, 1], [], []>} : vector<16x32xf32>, vector<32x64xf32>, vector<16x64xf32> -> vector<16x64xf32>
    %c0_5 = arith.constant 0 : index
    %c0_6 = arith.constant 0 : index
    %5 = vector.load %arg4[%c0_5, %c0_6] : memref<1x64xf32, #tpu.memory_space<vmem>>, vector<1x64xf32>
    %6 = vector.broadcast %5 : vector<1x64xf32> to vector<16x64xf32>
    %7 = arith.addf %4, %6 : vector<16x64xf32>
    %c0_7 = arith.constant 0 : index
    %c0_8 = arith.constant 0 : index
    %c0_9 = arith.constant 0 : index
    %8 = vector.load %arg5[%c0_7, %c0_8, %c0_9] : memref<1x16x64xf32, #tpu.memory_space<vmem>>, vector<1x16x64xf32>
    %9 = vector.shape_cast %8 : vector<1x16x64xf32> to vector<16x64xf32>
    %10 = vector.shape_cast %7 : vector<16x64xf32> to vector<1x16x64xf32>
    tpu.vector_store %arg5[%c0_7, %c0_8, %c0_9], %10 {strides = array<i32>} : memref<1x16x64xf32, #tpu.memory_space<vmem>>, vector<1x16x64xf32>,
    return
  }
  func.func @transform_0(%arg0: i32, %arg1: i32) -> (i32, i32, i32) {
    %c0_i32 = arith.constant 0 : i32
    %c0_i32_0 = arith.constant 0 : i32
    return %arg0, %arg1, %c0_i32 : i32, i32, i32
  }
  func.func @transform_1(%arg0: i32, %arg1: i32) -> (i32, i32, i32) {
    %c0_i32 = arith.constant 0 : i32
    %c0_i32_0 = arith.constant 0 : i32
    %c0_i32_1 = arith.constant 0 : i32
    return %arg0, %c0_i32, %c0_i32_0 : i32, i32, i32
  }
  func.func @transform_2(%arg0: i32, %arg1: i32) -> (i32, i32) {
    %c0_i32 = arith.constant 0 : i32
    %c0_i32_0 = arith.constant 0 : i32
    %c0_i32_1 = arith.constant 0 : i32
    return %c0_i32, %c0_i32_0 : i32, i32
  }
  func.func @transform_3(%arg0: i32, %arg1: i32) -> (i32, i32, i32) {
    %c0_i32 = arith.constant 0 : i32
    %c0_i32_0 = arith.constant 0 : i32
    return %arg0, %arg1, %c0_i32 : i32, i32, i32
  }
}

module attributes {stable_mosaic.version = 11 : i64} {
  func.func @lora_kv_kernel(%arg0: i32, %arg1: i32, %arg2: memref<1x16x32xf32, #tpu.memory_space<vmem>>, %arg3: memref<1x32x64xf32, #tpu.memory_space<vmem>>, %arg4: memref<1x64xf32, #tpu.memory_space<vmem>>, %arg5: memref<1x16x64xf32, #tpu.memory_space<vmem>>) attributes {dimension_semantics = [#tpu.dimension_semantics<parallel>, #tpu.dimension_semantics<parallel>], iteration_bounds = array<i64: 4, 1>, scalar_prefetch = 0 : i64, scratch_operands = 0 : i64, tpu.core_type = #tpu.core_type<tc>, window_params = [{transform_indices = @transform_0, window_bounds = array<i64: 1, 16, 32>}, {transform_indices = @transform_1, window_bounds = array<i64: 1, 32, 64>}, {pipeline_mode = #tpu.pipeline_mode<synchronous>, transform_indices = @transform_2, window_bounds = array<i64: 1, 64>}, {transform_indices = @transform_3, window_bounds = array<i64: 1, 16, 64>}]} {
    %c0 = arith.constant 0 : index
    %c0_0 = arith.constant 0 : index
    %c0_1 = arith.constant 0 : index
    %0 = vector.load %arg2[%c0, %c0_0, %c0_1] : memref<1x16x32xf32, #tpu.memory_space<vmem>>, vector<1x16x32xf32>
    %1 = vector.shape_cast %0 : vector<1x16x32xf32> to vector<16x32xf32>
    %c0_2 = arith.constant 0 : index
    %c0_3 = arith.constant 0 : index
    %c0_4 = arith.constant 0 : index
    %2 = vector.load %arg3[%c0_2, %c0_3, %c0_4] : memref<1x32x64xf32, #tpu.memory_space<vmem>>, vector<1x32x64xf32>
    %3 = vector.shape_cast %2 : vector<1x32x64xf32> to vector<32x64xf32>
    %cst = arith.constant dense<0.000000e+00> : vector<16x64xf32>
    %4 = tpu.matmul %1, %3, %cst {dimension_numbers = #tpu.dot_dimension_numbers<[1], [0], [0], [1], [0, 0, 1, 1], [], []>} : vector<16x32xf32>, vector<32x64xf32>, vector<16x64xf32> -> vector<16x64xf32>
    %c0_5 = arith.constant 0 : index
    %c0_6 = arith.constant 0 : index
    %5 = vector.load %arg4[%c0_5, %c0_6] : memref<1x64xf32, #tpu.memory_space<vmem>>, vector<1x64xf32>
    %6 = vector.broadcast %5 : vector<1x64xf32> to vector<16x64xf32>
    %7 = arith.addf %4, %6 : vector<16x64xf32>
    %c0_7 = arith.constant 0 : index
    %c0_8 = arith.constant 0 : index
    %c0_9 = arith.constant 0 : index
    %8 = vector.load %arg5[%c0_7, %c0_8, %c0_9] : memref<1x16x64xf32, #tpu.memory_space<vmem>>, vector<1x16x64xf32>
    %9 = vector.shape_cast %8 : vector<1x16x64xf32> to vector<16x64xf32>
    %10 = vector.shape_cast %7 : vector<16x64xf32> to vector<1x16x64xf32>
    tpu.vector_store %arg5[%c0_7, %c0_8, %c0_9], %10 {strides = array<i32>} : memref<1x16x64xf32, #tpu.memory_space<vmem>>, vector<1x16x64xf32>,
    return
  }
  func.func @transform_0(%arg0: i32, %arg1: i32) -> (i32, i32, i32) {
    %c0_i32 = arith.constant 0 : i32
    %c0_i32_0 = arith.constant 0 : i32
    return %arg0, %arg1, %c0_i32 : i32, i32, i32
  }
  func.func @transform_1(%arg0: i32, %arg1: i32) -> (i32, i32, i32) {
    %c0_i32 = arith.constant 0 : i32
    %c0_i32_0 = arith.constant 0 : i32
    %c0_i32_1 = arith.constant 0 : i32
    return %arg0, %c0_i32, %c0_i32_0 : i32, i32, i32
  }
  func.func @transform_2(%arg0: i32, %arg1: i32) -> (i32, i32) {
    %c0_i32 = arith.constant 0 : i32
    %c0_i32_0 = arith.constant 0 : i32
    %c0_i32_1 = arith.constant 0 : i32
    return %c0_i32, %c0_i32_0 : i32, i32
  }
  func.func @transform_3(%arg0: i32, %arg1: i32) -> (i32, i32, i32) {
    %c0_i32 = arith.constant 0 : i32
    %c0_i32_0 = arith.constant 0 : i32
    return %arg0, %arg1, %c0_i32 : i32, i32, i32
  }
}

</mosaic_0001>

<bundles_post_ra>
// kernel: tpu_custom_call.1
= control target key start
LH: loop header
LB: loop body
LE: loop exit
PB: predicated region body
PF: predicated region fallthrough
CT: control target
= control target key end

     0   :  { %8 = vsyncpa [#allocation3], 0  ;;  %s920_s0 = inlined_call_operand.hbm [shape: f32[4,16,32], index: 0, kind: input, shape index: {}]   ;;  %s921_s1 = inlined_call_operand.hbm [shape: f32[4,32,64], index: 1, kind: input, shape index: {}]   ;;  %s922_s2 = inlined_call_operand.vmem [shape: f32[1,64], index: 2, kind: input, shape index: {}]   ;;  %s923_s3 = inlined_call_operand.hbm [shape: f32[4,16,64], index: 3, kind: output, shape index: {}]  }
   0x1   :  { %10 = vsyncpa [#allocation3 + $0x1], 0 }
   0x2   :  { %11 = vsyncpa [#allocation6], 0 }
   0x3   :  { %12 = vsyncpa [#allocation4], 0 }
   0x4   :  { %14 = vsyncpa [#allocation4 + $0x1], 0  ;;  %s727_s12 = smov 0   ;;  %s729_s13 = smov 0  }
   0x5   :  { %s731_s14 = smov 0   ;;  %s733_s15 = smov 0  }
   0x6   :  { %s735_s16 = smov 0   ;;  %s737_s17 = smov 0  }
   0x7 LB: > { %s445_s18 = sadd.s32 4294967295, %s698_s17   ;;  %s446_s19 = sadd.s32 4294967294, %s698_s17   ;;  %s698_s17 = sphi %s737_s17, %s20_s17   ;;  %s694_s16 = sphi %s735_s16, %s942_s16   ;;  %s690_s15 = sphi %s733_s15, %s941_s15   ;;  %s686_s14 = sphi %s731_s14, %s940_s14   ;;  %s682_s13 = sphi %s729_s13, %s939_s13   ;;  %s678_s12 = sphi %s727_s12, %s938_s12  }
   0x8   : > { %p54_p0 = scmp.ne.s32.totalorder %s682_s13, %s678_s12  ;;  %p55_p1 = scmp.eq.s32.totalorder %s445_s18, 0 }
   0x9   : > { %p761_p2 = scmp.eq.s32.totalorder %s445_s18, 3  ;;  %p133_p3 = scmp.eq.s32.totalorder %s446_s19, 3 }
   0xa   : > { %p765_p4 = por %p55_p1, %p54_p0  ;;  %p447_p5 = scmp.ge.s32.totalorder %s698_s17, 1 }
   0xb   : > { %s927_s20 = scalar_select %p761_p2, 1, 0 }
   0xc   : > { %s928_s21 = scalar_select %p765_p4, 1, 0 }
   0xd   : > { %p770_p6 = por %p133_p3, %p54_p0  ;;  %p140_p7 = scmp.lt.s32.totalorder %s698_s17, 5 }
   0xe   : > { %s465_s23 = sshll.u32 %s690_s15, 9  ;;  %s700_s28 = smov [#allocation5]  }
   0xf   : > { %s929_s22 = scalar_select %p770_p6, 1, 0 }
  0x10   : > { %p776_p8 = pnand %p447_p5, %p140_p7  ;;  %s783_s27 = scalar_lea.hbm %s921_s1, %s465_s23 }
  0x11   : > { %s155_s29 = sshll.u32 %s700_s28, 4  ;;  %s558_s4 = scalar_lea.hbm %s783_s27, 512  ;;  %s156_s29 = int_to_ptr.vmem [resolvable:$true] %s155_s29 }
  0x12   : > { %s930_s24 = scalar_select %p776_p8, 1, 0 }
  0x13   : > { %p491_p9 = pneg %p776_p8  ;;  %p559_p11 = scmp.ne.s32.totalorder %s783_s27, %s558_s4 }
  0x14   : > { %s563_s7 = scalar_lea.hbm %s921_s1, 2048  ;;  %p564_p1 = scmp.lt.s32.totalorder %s783_s27, %s921_s1 }
  0x15   : > { %p789_p10 = pnand %p491_p9, %p765_p4  ;;  %p565_p3 = scmp.lt.s32.totalorder %s563_s7, %s558_s4 }
  0x17   : > { %p560_p12 = pneg %p789_p10  ;;  %p566_p5 = por %p565_p3, %p564_p1 }
  0x19   : > { %p561_p13 = pnand %p560_p12, %p559_p11 }
  0x1b   : > { %p562_p0 = pneg %p561_p13 }
  0x1d   : > { %p567_p7 = pnand %p566_p5, %p562_p0 }
  0x1f   : > { %570 = shalt.err (!%p567_p7)
}
  0x20   : > { %s571_s10 = scalar_lea.vmem %s156_s29, 512  ;;  %p579_p8 = scmp.lt.s32.totalorder %s156_s29, %s156_s29 }
  0x21   : > { %p572_p9 = scmp.ne.s32.totalorder %s156_s29, %s571_s10  ;;  %p580_p2 = scmp.lt.s32.totalorder %s571_s10, %s571_s10 }
  0x23   : > { %p574_p6 = pnand %p572_p9, %p560_p12  ;;  %p581_p11 = por %p580_p2, %p579_p8 }
  0x25   : > { %p575_p4 = pneg %p574_p6 }
  0x27   : > { %p582_p13 = pnand %p581_p11, %p575_p4 }
  0x29   : > { %585 = shalt.err (!%p582_p13)
}
  0x2a   : > { %s701_s11 = smov 128   ;;  %s702_s18 = smov 8  }
  0x2b   : > { %494 = dma.hbm_to_vmem [thread:$0]  (!%p789_p10), %s783_s27, 512, %s156_s29, [#allocation6], %s701_s11, %s701_s11, %s702_s18  }
  0x2c   : > { %s32_s19 = sadd.s32 1, %s694_s16  ;;  %s41_s23 = sadd.s32 1, %s686_s14 }
  0x2d   : > { %p34_p2 = scmp.ge.s32.totalorder %s32_s19, 4  ;;  %p48_p4 = scmp.ne.s32.totalorder %s686_s14, %s682_s13 }
  0x2e   : > { %p49_p6 = scmp.eq.s32.totalorder %s698_s17, 0  ;;  %p503_p8 = scmp.lt.s32.totalorder %s698_s17, 4 }
  0x2f   : > { %s944_s19 = smov (%p34_p2, %s32_s19), 0  ;;  %p932_p0 = scmp.ne.s32.totalorder %s927_s20, 0 }
  0x30   : > { %p50_p12 = por %p49_p6, %p48_p4  ;;  %s36_s26 = ssub.s32 %s694_s16, %s944_s19 }
  0x31   : > { %p820_p1 = por %p932_p0, %p48_p4  ;;  %s172_s28 = sand.u32 1, %s686_s14  }
  0x32   : > { %p39_p3 = scmp.eq.s32.totalorder %s36_s26, 0  ;;  %s451_s27 = sshll.u32 %s172_s28, 4 }
  0x33   : > { %s466_s29 = sshll.u32 %s694_s16, 8  ;;  %s176_s7 = scalar_lea.vmem [#allocation2], %s451_s27 }
  0x34   : > { %s829_s30 = scalar_select %p39_p3, %s686_s14, %s41_s23  }
  0x35   : > { %s184_s6 = scalar_lea.hbm %s920_s0, %s466_s29  ;;  %s185_s8 = sshll.u32 %s176_s7, 4  ;;  %s186_s8 = int_to_ptr.vmem [resolvable:$true] %s185_s8 }
  0x36   : > { %p836_p10 = pnand %p503_p8, %p50_p12  ;;  %s173_s9 = scalar_lea.sflag [#allocation3], %s172_s28 }
  0x37   : > { %s599_s10 = scalar_lea.vmem %s186_s8, 256  ;;  %s703_s23 = smov [#allocation2]  }
  0x38   : > { %p588_p5 = pneg %p836_p10  ;;  %p600_p7 = scmp.ne.s32.totalorder %s186_s8, %s599_s10 }
  0x39   : > { %s604_s26 = sshll.u32 %s703_s23, 4  ;;  %s605_s26 = int_to_ptr.vmem [resolvable:$false] %s604_s26 }
  0x3a   : > { %p602_p9 = pnand %p600_p7, %p588_p5  ;;  %s606_s29 = scalar_lea.vmem %s605_s26, 512 }
  0x3b   : > { %p607_p13 = scmp.lt.s32.totalorder %s186_s8, %s605_s26  ;;  %p608_p2 = scmp.lt.s32.totalorder %s606_s29, %s599_s10 }
  0x3c   : > { %p603_p11 = pneg %p602_p9 }
  0x3d   : > { %p609_p4 = por %p608_p2, %p607_p13 }
  0x3f   : > { %p610_p6 = pnand %p609_p4, %p603_p11 }
  0x41   : > { %613 = shalt.err (!%p610_p6)
}
  0x42   : > { %498 = dma.hbm_to_vmem [thread:$0]  (!%p836_p10), %s184_s6, 256, %s186_s8, %s173_s9, %s701_s11, %s701_s11, %s702_s18  }
  0x43   : > { %p935_p8 = scmp.ne.s32.totalorder %s930_s24, 0 }
  0x44   : > { %s850_s28 = sand.u32 (!%p935_p8), 1, %s682_s13   ;;  %p936_p12 = scmp.ne.s32.totalorder (!%p935_p8), %s928_s21, 0 }
  0x45   : > { %197 = sbr.rel (%p935_p8) target bundleno = 297 (0x129), region = 32  ;;  %s455_s27 = sshll.u32 (!%p935_p8), %s850_s28, 4 }
  0x46   : > { %s200_s4 = scalar_lea.sflag (!%p935_p8), [#allocation3], %s850_s28  ;;  %s203_s5 = scalar_lea.vmem (!%p935_p8), [#allocation2], %s455_s27 }
  0x4a   : > { %665 = dma.done.wait (%p936_p12), %s200_s4, 256  }
  0x4b   : > { %667 = vsyncadd (%p936_p12), %s200_s4, 4294967040 }
  0x4c   : > { %669 = dma.done.wait (%p936_p12), [#allocation6], 512  }
  0x4d   : > { %671 = vsyncadd (%p936_p12), [#allocation6], 4294966784  ;;  %vm245_vm0 = vcmask 261120   ;;  %v237_v0 = vld [vmem:[#allocation5 + $0x18] sm:$0xff]  ;;  %v236_v1 = vld [vmem:[#allocation5 + $0x10] sm:$0xff]  ;;  %s229_s11 = scalar_lea.vmem [#allocation7], %s455_s27 }
  0x4e   : > { %474 = vmatprep.subr.mxu0 %v237_v0  ;;  %v232_v2 = vld [vmem:[%s203_s5] sm:$0xff]  ;;  %v235_v3 = vld [vmem:[#allocation5 + $0x8] sm:$0xff]  ;;  %s346_s18 = sshll.u32 %s229_s11, 4  ;;  %s467_s6 = sshll.u32 %s690_s15, 8  ;;  %vm327_vm1 = vcmask 523264   ;;  %s868_s18 = int_to_ptr.vmem [resolvable:$true] %s346_s18 }
  0x4f   : > { %475 = vmatpush3.msra.mxu0 %v237_v0  ;;  %482 = vmatprep.mubr.msk.f32.mxu0 %vm245_vm0, %v232_v2  ;;  %v234_v4 = vld [vmem:[#allocation5] sm:$0xff]  ;;  %v233_v5 = vld [vmem:[%s203_s5 + $0x8] sm:$0xff]  ;;  %s873_s20 = scalar_lea.hbm %s923_s3, %s467_s6  ;;  %s331_s9 = scalar_lea.sflag [#allocation4], %s850_s28 }
  0x50   : > { %476 = vmatprep.subr.mxu0 %v236_v1  ;;  %v457_v6 = vld [vmem:[%s922_s2] ss:$0 sm:$0xff]  ;;  %s614_s10 = scalar_lea.vmem %s868_s18, 256  ;;  %s704_s15 = smov [#allocation7]  }
  0x51   : > { %477 = vmatpush3.msra.mxu0 %v236_v1  ;;  %p615_p0 = scmp.ne.s32.totalorder %s868_s18, %s614_s10  ;;  %s618_s23 = sshll.u32 %s704_s15, 4  ;;  %s619_s23 = int_to_ptr.vmem [resolvable:$false] %s618_s23 }
  0x52   : > { %478 = vmatprep.subr.mxu0 %v235_v3  ;;  %s620_s26 = scalar_lea.vmem %s619_s23, 512  ;;  %p621_p5 = scmp.lt.s32.totalorder %s868_s18, %s619_s23 }
  0x53   : > { %479 = vmatpush3.msra.mxu0 %v235_v3  ;;  %p616_p3 = pnand %p615_p0, %p820_p1  ;;  %p622_p7 = scmp.lt.s32.totalorder %s620_s26, %s614_s10 }
  0x54   : > { %480 = vmatprep.subr.mxu0 %v234_v4 }
  0x55   : > { %481 = vmatpush3.msra.mxu0 %v234_v4  ;;  %p617_p10 = pneg %p616_p3  ;;  %p623_p9 = por %p622_p7, %p621_p5 }
  0x56   : > { %483 = vmatmul.mubr.msk.f32.vlgmr.msra.gmra.mxu0 %vm245_vm0, %v233_v5 }
  0x57   : > { %p624_p11 = pnand %p623_p9, %p617_p10 }
 0x116   : > { %v484_v7 = vpop.f32.mrf.mxu0 }
 0x117   : > { %v324_v8 = vadd.f32 %v484_v7, %v457_v6 }
 0x118   : > { %v318_v9 = vpop.f32.mrf.mxu0 }
 0x119   : > { %329 = vst.msk [vmem:[%s229_s11 + $0x8] sm:$0xff] %vm327_vm1, %v324_v8  ;;  %v319_v10 = vadd.f32 %v457_v6, %v318_v9 }
 0x11b   : > { %328 = vst.msk [vmem:[%s229_s11] sm:$0xff] %vm327_vm1, %v319_v10 }
 0x11c   : > { %627 = shalt.err (!%p624_p11)
}
 0x11d   : > { %s628_s29 = scalar_lea.hbm %s873_s20, 256  ;;  %s632_s5 = scalar_lea.hbm %s923_s3, 1024 }
 0x11e   : > { %p629_p13 = scmp.ne.s32.totalorder %s873_s20, %s628_s29  ;;  %p633_p6 = scmp.lt.s32.totalorder %s873_s20, %s923_s3 }
 0x11f   : > { %p634_p8 = scmp.lt.s32.totalorder %s632_s5, %s628_s29 }
 0x120   : > { %p630_p2 = pnand %p629_p13, %p820_p1 }
 0x121   : > { %p635_p12 = por %p634_p8, %p633_p6 }
 0x122   : > { %p631_p4 = pneg %p630_p2 }
 0x124   : > { %p636_p0 = pnand %p635_p12, %p631_p4 }
 0x126   : > { %639 = shalt.err (!%p636_p0)
}
 0x127   : > { %s705_s11 = smov 128   ;;  %s706_s6 = smov 8  }
 0x128   : > { %489 = dma.vmem_to_hbm [thread:$0]  (%p820_p1), %s868_s18, 256, %s873_s20, %s331_s9, %s705_s11, %s705_s11, %s706_s6  }
 0x129 PF: > { %p504_p3 = scmp.ge.s32.totalorder %s698_s17, 2  ;;  %s361_s7 = sand.u32 1, %s678_s12  }
 0x12a   : > { %p937_p10 = scmp.ne.s32.totalorder %s929_s22, 0  ;;  %s362_s8 = scalar_lea.sflag [#allocation4], %s361_s7 }
 0x12c   : > { %p500_p5 = pnand %p504_p3, %p937_p10 }
 0x12e   : > { %p501_p7 = pneg %p500_p5 }
 0x130   : > { %673 = dma.done.wait (%p501_p7), %s362_s8, 256  }
 0x131   : > { %675 = vsyncadd (%p501_p7), %s362_s8, 4294967040  ;;  %s20_s17 = sadd.s32 1, %s698_s17   ;;  %s938_s12 = smov %s682_s13 }
 0x132   : > { %p17_p9 = scmp.ge.s32.totalorder %s20_s17, 6   ;;  %s939_s13 = smov %s686_s14 }
 0x133   : > { %s940_s14 = smov %s829_s30  ;;  %s941_s15 = smov %s694_s16 }
 0x134   : > { %s942_s16 = smov %s944_s19  ;;  %19 = sbr.rel (!%p17_p9) target bundleno = 7 (0x7), region = 82 }
 0x139   :  { %367 = vsyncpa [#allocation3], 1 }
 0x13a   :  { %369 = vsyncpa [#allocation3 + $0x1], 1 }
 0x13b   :  { %370 = vsyncpa [#allocation6], 1 }
 0x13c   :  { %371 = vsyncpa [#allocation4], 1 }
 0x13d   :  { %373 = vsyncpa [#allocation4 + $0x1], 1 }

// kernel: tpu_custom_call.1
= control target key start
LH: loop header
LB: loop body
LE: loop exit
PB: predicated region body
PF: predicated region fallthrough
CT: control target
= control target key end

     0   :  { %s934_s0 = inlined_call_operand.hbm [shape: f32[4,16,32], index: 0, kind: input, shape index: {}]   ;;  %s935_s1 = inlined_call_operand.hbm [shape: f32[4,32,64], index: 1, kind: input, shape index: {}]   ;;  %s936_s2 = inlined_call_operand.vmem [shape: f32[1,64], index: 2, kind: input, shape index: {}]   ;;  %s937_s3 = inlined_call_operand.hbm [shape: f32[4,16,64], index: 3, kind: output, shape index: {}]  }
   0x1   :  { %938 = sst [smem:[#allocation11_spill]] %s934_s0 }
   0x2   :  { %8 = vsyncpa [#allocation3], 0 }
   0x3   :  { %10 = vsyncpa [#allocation3 + $0x1], 0 }
   0x4   :  { %11 = vsyncpa [#allocation6], 0 }
   0x5   :  { %13 = vsyncpa [#allocation6 + $0x1], 0 }
   0x6   :  { %14 = vsyncpa [#allocation4], 0 }
   0x7   :  { %16 = vsyncpa [#allocation4 + $0x1], 0  ;;  %s755_s12 = smov 0   ;;  %s757_s13 = smov 0  }
   0x8   :  { %s759_s14 = smov 0   ;;  %s761_s15 = smov 0  }
   0x9   :  { %s763_s16 = smov 0   ;;  %s765_s17 = smov 0  }
   0xa LB: > { %s473_s18 = sadd.s32 4294967295, %s726_s17   ;;  %s474_s19 = sadd.s32 4294967294, %s726_s17   ;;  %s726_s17 = sphi %s765_s17, %s22_s17   ;;  %s722_s16 = sphi %s763_s16, %s950_s16   ;;  %s718_s15 = sphi %s761_s15, %s949_s15   ;;  %s714_s14 = sphi %s759_s14, %s948_s14   ;;  %s710_s13 = sphi %s757_s13, %s947_s13   ;;  %s706_s12 = sphi %s755_s12, %s946_s12  }
   0xb   : > { %s34_s20 = sadd.s32 1, %s722_s16  ;;  %s43_s21 = sadd.s32 1, %s714_s14 }
   0xc   : > { %p36_p0 = scmp.ge.s32.totalorder %s34_s20, 4  ;;  %p50_p1 = scmp.ne.s32.totalorder %s714_s14, %s710_s13 }
   0xd   : > { %p51_p2 = scmp.eq.s32.totalorder %s726_s17, 0  ;;  %p56_p3 = scmp.ne.s32.totalorder %s710_s13, %s706_s12 }
   0xe   : > { %s952_s20 = smov (%p36_p0, %s34_s20), 0  ;;  %p57_p5 = scmp.eq.s32.totalorder %s473_s18, 0 }
   0xf   : > { %p796_p4 = por %p51_p2, %p50_p1  ;;  %s38_s23 = ssub.s32 %s722_s16, %s952_s20 }
  0x10   : > { %p129_p6 = scmp.eq.s32.totalorder %s473_s18, 3  ;;  %p41_p7 = scmp.eq.s32.totalorder %s38_s23, 0 }
  0x11   : > { %p802_p8 = por %p57_p5, %p56_p3  ;;  %p135_p10 = scmp.eq.s32.totalorder %s474_s19, 3 }
  0x12   : > { %p806_p9 = por %p129_p6, %p50_p1  ;;  %p532_p12 = scmp.lt.s32.totalorder %s726_s17, 4 }
  0x13   : > { %s811_s26 = scalar_select %p41_p7, %s714_s14, %s43_s21  }
  0x14   : > { %p813_p11 = por %p135_p10, %p56_p3  ;;  %s819_s28 = sand.u32 1, %s714_s14  }
  0x15   : > { %s477_s29 = sshll.u32 %s819_s28, 4  ;;  %s495_s30 = sshll.u32 %s722_s16, 8 }
  0x16   : > { %s943_s0 = sld [smem:[#allocation11_spill]]  ;;  %s162_s7 = scalar_lea.vmem [#allocation2], %s477_s29 }
  0x17   : > { %s171_s8 = sshll.u32 %s162_s7, 4  ;;  %p828_p13 = pnand %p532_p12, %p796_p4  ;;  %s172_s8 = int_to_ptr.vmem [resolvable:$true] %s171_s8 }
  0x18   : > { %p483_p0 = scmp.ge.s32.totalorder %s726_s17, 1  ;;  %s159_s10 = scalar_lea.sflag [#allocation3], %s819_s28 }
  0x19   : > { %p588_p1 = pneg %p828_p13  ;;  %s599_s11 = scalar_lea.vmem %s172_s8, 256 }
  0x1a   : > { %p600_p2 = scmp.ne.s32.totalorder %s172_s8, %s599_s11  ;;  %s728_s18 = smov [#allocation2]  }
  0x1b   : > { %s604_s19 = sshll.u32 %s728_s18, 4  ;;  %s605_s19 = int_to_ptr.vmem [resolvable:$false] %s604_s19 }
  0x1c   : > { %s170_s6 = scalar_lea.hbm %s943_s0, %s495_s30  ;;  %p602_p3 = pnand %p600_p2, %p588_p1 }
  0x1d   : > { %s606_s21 = scalar_lea.vmem %s605_s19, 512  ;;  %p607_p4 = scmp.lt.s32.totalorder %s172_s8, %s605_s19 }
  0x1e   : > { %p603_p5 = pneg %p602_p3  ;;  %p608_p6 = scmp.lt.s32.totalorder %s606_s21, %s599_s11 }
  0x20   : > { %p609_p7 = por %p608_p6, %p607_p4 }
  0x22   : > { %p610_p10 = pnand %p609_p7, %p603_p5 }
  0x24   : > { %613 = shalt.err (!%p610_p10)
}
  0x25   : > { %s729_s22 = smov 128   ;;  %s730_s23 = smov 8  }
  0x26   : > { %524 = dma.hbm_to_vmem [thread:$0]  (!%p828_p13), %s170_s6, 256, %s172_s8, %s159_s10, %s729_s22, %s729_s22, %s730_s23  }
  0x27   : > { %p200_p12 = scmp.lt.s32.totalorder %s726_s17, 5  ;;  %s480_s29 = sshll.u32 %s819_s28, 5 }
  0x28   : > { %s496_s30 = sshll.u32 %s722_s16, 9  ;;  %s185_s18 = scalar_lea.vmem [#allocation5], %s480_s29 }
  0x29   : > { %p846_p2 = pnand %p483_p0, %p200_p12  ;;  %s191_s11 = scalar_lea.hbm %s935_s1, %s496_s30 }
  0x2a   : > { %s192_s19 = sshll.u32 %s185_s18, 4  ;;  %s182_s21 = scalar_lea.sflag [#allocation6], %s819_s28  ;;  %s193_s19 = int_to_ptr.vmem [resolvable:$true] %s192_s19 }
  0x2b   : > { %s627_s0 = scalar_lea.vmem %s193_s19, 512  ;;  %s731_s6 = smov [#allocation5]  }
  0x2c   : > { %p628_p3 = scmp.ne.s32.totalorder %s193_s19, %s627_s0  ;;  %s632_s8 = sshll.u32 %s731_s6, 4  ;;  %s633_s8 = int_to_ptr.vmem [resolvable:$false] %s632_s8 }
  0x2d   : > { %s634_s10 = scalar_lea.vmem %s633_s8, 1024  ;;  %p635_p0 = scmp.lt.s32.totalorder %s193_s19, %s633_s8 }
  0x2e   : > { %p630_p5 = pnand %p628_p3, %p588_p1  ;;  %p636_p6 = scmp.lt.s32.totalorder %s634_s10, %s627_s0 }
  0x30   : > { %p631_p4 = pneg %p630_p5  ;;  %p637_p7 = por %p636_p6, %p635_p0 }
  0x32   : > { %p638_p10 = pnand %p637_p7, %p631_p4 }
  0x34   : > { %641 = shalt.err (!%p638_p10)
}
  0x35   : > { %527 = dma.hbm_to_vmem [thread:$0]  (!%p828_p13), %s191_s11, 512, %s193_s19, %s182_s21, %s729_s22, %s729_s22, %s730_s23  }
  0x36   : > { %204 = sbr.rel (%p846_p2) target bundleno = 283 (0x11b), region = 32  ;;  %s862_s28 = sand.u32 (!%p846_p2), 1, %s710_s13  }
  0x37   : > { %s484_s29 = sshll.u32 (!%p846_p2), %s862_s28, 4  ;;  %s207_s30 = scalar_lea.sflag (!%p846_p2), [#allocation3], %s862_s28 }
  0x38   : > { %s210_s5 = scalar_lea.vmem (!%p846_p2), [#allocation2], %s484_s29 }
  0x3b   : > { %693 = dma.done.wait (%p802_p8), %s207_s30, 256  }
  0x3c   : > { %695 = vsyncadd (%p802_p8), %s207_s30, 4294967040  ;;  %s485_s0 = sshll.u32 %s862_s28, 5  ;;  %s216_s9 = scalar_lea.sflag [#allocation6], %s862_s28 }
  0x3d   : > { %s219_s22 = scalar_lea.vmem [#allocation5], %s485_s0 }
  0x3e   : > { %697 = dma.done.wait (%p802_p8), %s216_s9, 512  }
  0x3f   : > { %699 = vsyncadd (%p802_p8), %s216_s9, 4294966784  ;;  %vm262_vm0 = vcmask 261120   ;;  %v254_v0 = vld [vmem:[%s219_s22 + $0x18] sm:$0xff]  ;;  %v253_v1 = vld [vmem:[%s219_s22 + $0x10] sm:$0xff]  ;;  %s246_s4 = scalar_lea.vmem [#allocation7], %s484_s29  ;;  %s497_s11 = sshll.u32 %s718_s15, 8 }
  0x40   : > { %504 = vmatprep.subr.mxu0 %v254_v0  ;;  %v249_v2 = vld [vmem:[%s210_s5] sm:$0xff]  ;;  %v252_v3 = vld [vmem:[%s219_s22 + $0x8] sm:$0xff]  ;;  %s363_s7 = sshll.u32 %s246_s4, 4  ;;  %vm344_vm1 = vcmask 523264   ;;  %s887_s21 = scalar_lea.hbm %s937_s3, %s497_s11  ;;  %s882_s7 = int_to_ptr.vmem [resolvable:$true] %s363_s7 }
  0x41   : > { %505 = vmatpush3.msra.mxu0 %v254_v0  ;;  %512 = vmatprep.mubr.msk.f32.mxu0 %vm262_vm0, %v249_v2  ;;  %v251_v4 = vld [vmem:[%s219_s22] sm:$0xff]  ;;  %v250_v5 = vld [vmem:[%s210_s5 + $0x8] sm:$0xff]  ;;  %s348_s6 = scalar_lea.sflag [#allocation4], %s862_s28  ;;  %s642_s8 = scalar_lea.vmem %s882_s7, 256 }
  0x42   : > { %506 = vmatprep.subr.mxu0 %v253_v1  ;;  %v487_v6 = vld [vmem:[%s936_s2] ss:$0 sm:$0xff]  ;;  %p643_p8 = scmp.ne.s32.totalorder %s882_s7, %s642_s8  ;;  %s732_s15 = smov [#allocation7]  }
  0x43   : > { %507 = vmatpush3.msra.mxu0 %v253_v1  ;;  %s646_s10 = sshll.u32 %s732_s15, 4  ;;  %s647_s10 = int_to_ptr.vmem [resolvable:$false] %s646_s10 }
  0x44   : > { %508 = vmatprep.subr.mxu0 %v252_v3  ;;  %p644_p13 = pnand %p643_p8, %p806_p9  ;;  %s648_s29 = scalar_lea.vmem %s647_s10, 512 }
  0x45   : > { %509 = vmatpush3.msra.mxu0 %v252_v3  ;;  %p649_p12 = scmp.lt.s32.totalorder %s882_s7, %s647_s10  ;;  %p650_p2 = scmp.lt.s32.totalorder %s648_s29, %s642_s8 }
  0x46   : > { %510 = vmatprep.subr.mxu0 %v251_v4  ;;  %p645_p1 = pneg %p644_p13 }
  0x47   : > { %511 = vmatpush3.msra.mxu0 %v251_v4  ;;  %p651_p3 = por %p650_p2, %p649_p12 }
  0x48   : > { %513 = vmatmul.mubr.msk.f32.vlgmr.msra.gmra.mxu0 %vm262_vm0, %v250_v5 }
  0x49   : > { %p652_p5 = pnand %p651_p3, %p645_p1 }
 0x108   : > { %v514_v7 = vpop.f32.mrf.mxu0 }
 0x109   : > { %v341_v8 = vadd.f32 %v514_v7, %v487_v6 }
 0x10a   : > { %v335_v9 = vpop.f32.mrf.mxu0 }
 0x10b   : > { %346 = vst.msk [vmem:[%s246_s4 + $0x8] sm:$0xff] %vm344_vm1, %v341_v8  ;;  %v336_v10 = vadd.f32 %v487_v6, %v335_v9 }
 0x10d   : > { %345 = vst.msk [vmem:[%s246_s4] sm:$0xff] %vm344_vm1, %v336_v10 }
 0x10e   : > { %655 = shalt.err (!%p652_p5)
}
 0x10f   : > { %s656_s30 = scalar_lea.hbm %s887_s21, 256  ;;  %s660_s9 = scalar_lea.hbm %s937_s3, 1024 }
 0x110   : > { %p657_p4 = scmp.ne.s32.totalorder %s887_s21, %s656_s30  ;;  %p661_p7 = scmp.lt.s32.totalorder %s887_s21, %s937_s3 }
 0x111   : > { %p662_p10 = scmp.lt.s32.totalorder %s660_s9, %s656_s30 }
 0x112   : > { %p658_p0 = pnand %p657_p4, %p806_p9 }
 0x113   : > { %p663_p8 = por %p662_p10, %p661_p7 }
 0x114   : > { %p659_p6 = pneg %p658_p0 }
 0x116   : > { %p664_p13 = pnand %p663_p8, %p659_p6 }
 0x118   : > { %667 = shalt.err (!%p664_p13)
}
 0x119   : > { %s733_s23 = smov 128   ;;  %s734_s4 = smov 8  }
 0x11a   : > { %519 = dma.vmem_to_hbm [thread:$0]  (%p806_p9), %s882_s7, 256, %s887_s21, %s348_s6, %s733_s23, %s733_s23, %s734_s4  }
 0x11b PF: > { %p533_p1 = scmp.ge.s32.totalorder %s726_s17, 2  ;;  %s378_s11 = sand.u32 1, %s706_s12  }
 0x11c   : > { %s379_s18 = scalar_lea.sflag [#allocation4], %s378_s11 }
 0x11d   : > { %p529_p12 = pnand %p533_p1, %p813_p11 }
 0x11f   : > { %p530_p2 = pneg %p529_p12 }
 0x121   : > { %701 = dma.done.wait (%p530_p2), %s379_s18, 256  }
 0x122   : > { %703 = vsyncadd (%p530_p2), %s379_s18, 4294967040  ;;  %s22_s17 = sadd.s32 1, %s726_s17   ;;  %s946_s12 = smov %s710_s13 }
 0x123   : > { %p19_p3 = scmp.ge.s32.totalorder %s22_s17, 6   ;;  %s947_s13 = smov %s714_s14 }
 0x124   : > { %s948_s14 = smov %s811_s26  ;;  %s949_s15 = smov %s722_s16 }
 0x125   : > { %s950_s16 = smov %s952_s20  ;;  %21 = sbr.rel (!%p19_p3) target bundleno = 10 (0xa), region = 90 }
 0x12a   :  { %384 = vsyncpa [#allocation3], 1 }
 0x12b   :  { %386 = vsyncpa [#allocation3 + $0x1], 1 }
 0x12c   :  { %387 = vsyncpa [#allocation6], 1 }
 0x12d   :  { %389 = vsyncpa [#allocation6 + $0x1], 1 }
 0x12e   :  { %390 = vsyncpa [#allocation4], 1 }
 0x12f   :  { %392 = vsyncpa [#allocation4 + $0x1], 1 }

</bundles_post_ra>
